<compile_context>
chip_gen: v7x
topology: tpu7x:2x2x1
jax: 0.10.0
libtpu: 0.0.40
codegen_flags: <defaults>
</compile_context>

<pallas_src>
import jax
import jax.numpy as jnp
from jax import lax
from jax.experimental import pallas as pl
from jax.experimental.pallas import tpu as pltpu

CHANNEL = 4                      # module was built with channel=4 -> groups of 1
POOL_SIZES = (1, 2, 4, 8)        # pooling_1 .. pooling_8
EPS = 1e-5                       # BatchNorm eps


def _make_kernel(C, H, W, Bt):
    """Kernel for one batch tile of Bt images, presented as a (Bt*C, H*W) slab."""
    Cg = C // 4
    HW = H * W
    R = Bt * C
    n_levels = 3                  # pool sizes up to 2**3 = 8

    def kernel(x_ref, wz_ref, b_ref, o_ref):
        x = x_ref[...]                                          # (R, HW) f32

        # Static masks straight from index bits (no runtime iota rolls).
        lane = lax.broadcasted_iota(jnp.int32, (R, HW), 1)      # lane = h*W + w
        row = lax.broadcasted_iota(jnp.int32, (R, HW), 0)       # row  = b*C + c
        if (C & (C - 1)) == 0:
            cix = row & (C - 1)                                 # channel index
        else:
            cix = row % C

        # Gated max butterfly over the whole slab: 6 levels (W bits 0..2, then
        # H bits log2W..log2W+2).  pltpu.roll follows jnp.roll semantics
        # (roll(v, s)[l] == v[l - s]), so lanes with bit `s` set take their
        # in-block partner from roll(+s), the others from roll(HW - s).
        v = x
        for j in range(n_levels):
            need = cix >= (j + 1) * Cg            # rows whose pool size > 2**j
            for s in (1 << j, W << j):            # W-bit level, then H-bit level
                bit_set = (lane & s) != 0
                partner = jnp.where(bit_set,
                                    pltpu.roll(v, s, 1),
                                    pltpu.roll(v, HW - s, 1))
                v = jnp.where(need, jnp.maximum(v, partner), v)
        # v now holds P: MaxPool(k) fused with nearest upsample, row by row.

        # Folded channel mix out_b = Wp @ P_b + Wx @ x_b + bias, done as VPU
        # outer-product FMAs producing all C output channels per step.
        wz = wz_ref[...]                                        # (C, 2C) [Wp|Wx]
        bias = jnp.broadcast_to(b_ref[...], (C, HW))            # hoisted once

        for bi in range(Bt):
            r0 = bi * C
            acc = bias
            for c in range(C):
                acc = acc + wz[:, c:c + 1] * v[r0 + c:r0 + c + 1, :]
                acc = acc + wz[:, C + c:C + c + 1] * x[r0 + c:r0 + c + 1, :]
            o_ref[r0:r0 + C, :] = acc                           # direct slab store

    return kernel


def fold_params(params):
    """Fold both conv+BN stages into a single (C, 2C) weight and (C,) bias."""
    group_ws, group_bns, w_cat, bn_cat = params
    C = w_cat.shape[0]
    Cg = C // 4

    # Per-group conv + BN (inference mode):  y_i = A_i @ P_i + b_i
    A = jnp.zeros((C, C), jnp.float32)
    b_group = jnp.zeros((C,), jnp.float32)
    for i, (w, (g, b, m, var)) in enumerate(zip(group_ws, group_bns)):
        s = g / jnp.sqrt(var + EPS)
        A = A.at[i * Cg:(i + 1) * Cg, i * Cg:(i + 1) * Cg].set(s[:, None] * w)
        b_group = b_group.at[i * Cg:(i + 1) * Cg].set(b - m * s)

    # Final conv + BN, composed with the group stage.
    g, b, m, var = bn_cat
    s = g / jnp.sqrt(var + EPS)
    w_full = s[:, None] * w_cat                      # (C, 2C)
    w_y, w_x = w_full[:, :C], w_full[:, C:]
    w_p = w_y @ A                                    # acts on pooled planes P
    bias = (b - m * s) + w_y @ b_group               # (C,)

    wz = jnp.concatenate([w_p, w_x], axis=1).astype(jnp.float32)   # (C, 2C)
    return wz, bias.astype(jnp.float32).reshape(C, 1)


def psp_pooling_forward(x_nchw, params, *, max_batch_tile=8):
    """x_nchw: (N, C, H, W) float32 -> (N, C, H, W) float32."""
    N, C, H, W = x_nchw.shape
    assert C % 4 == 0, "PSP_Pooling splits channels into 4 groups"
    assert W >= 8 and (W & (W - 1)) == 0, "lane-bit pooling needs W = power of two >= 8"
    assert H % 8 == 0, "lane-bit pooling needs H to be a multiple of 8"
    assert (H * W) % 128 == 0, "lane-dense layout needs H*W to be a multiple of 128"

    HW = H * W
    wz, bias = fold_params(params)
    x_slab = x_nchw.reshape(N * C, HW).astype(jnp.float32)   # lane-dense slab

    # Batch tile: as many images per grid step as reasonable (sublane-dense,
    # amortizes the ~0.35us/step overhead).  Bt*C must be a multiple of 8
    # unless the block covers the whole batch (full-dim blocks are exempt).
    Bt = N
    for cand in range(min(N, max_batch_tile), 0, -1):
        if N % cand == 0 and (cand == N or (cand * C) % 8 == 0):
            Bt = cand
            break
    R = Bt * C

    kernel = _make_kernel(C, H, W, Bt)
    out = pl.pallas_call(
        kernel,
        out_shape=jax.ShapeDtypeStruct((N * C, HW), jnp.float32),
        grid=(N // Bt,),
        in_specs=[
            pl.BlockSpec((R, HW), lambda n: (n, 0)),        # x slab (VMEM)
            pl.BlockSpec((C, 2 * C), lambda n: (0, 0)),     # folded weights [Wp|Wx]
            pl.BlockSpec((C, 1), lambda n: (0, 0)),         # folded bias
        ],
        out_specs=pl.BlockSpec((R, HW), lambda n: (n, 0)),
        compiler_params=pltpu.CompilerParams(
            dimension_semantics=("parallel",)),             # v7x: 2 TCs over batch
    )(x_slab, wz, bias)

    return out.reshape(N, C, H, W)


def reference_forward(x, params):
    """Pure-JAX reference replicating the PyTorch module (inference-mode BN)."""
    group_ws, group_bns, w_cat, bn_cat = params
    N, C, H, W = x.shape
    Cg = C // 4

    def bn(v, p):
        g, b, m, var = p
        return ((v - m[None, :, None, None])
                / jnp.sqrt(var[None, :, None, None] + EPS)
                * g[None, :, None, None] + b[None, :, None, None])

    outs = []
    for i, k in enumerate(POOL_SIZES):
        xi = x[:, i * Cg:(i + 1) * Cg]
        if k > 1:
            p = lax.reduce_window(xi, -jnp.inf, lax.max,
                                  (1, 1, k, k), (1, 1, k, k), 'VALID')
        else:
            p = xi
        c = jnp.einsum('nihw,oi->nohw', p, group_ws[i])    # 1x1 conv, no bias
        c = bn(c, group_bns[i])
        if k > 1:                                          # nearest upsample
            c = jnp.repeat(jnp.repeat(c, k, axis=2), k, axis=3)
        outs.append(c)

    z = jnp.concatenate(outs + [x], axis=1)                # (N, 2C, H, W)
    c = jnp.einsum('nihw,oi->nohw', z, w_cat)              # 1x1 conv, no bias
    return bn(c, bn_cat)


def make_params(key, C):
    """Deterministic synthetic parameters (not a checkpoint load)."""
    Cg = C // 4
    keys = jax.random.split(key, 5)

    group_ws, group_bns = [], []
    for i in range(4):
        group_ws.append(0.5 * jax.random.normal(keys[i], (Cg, Cg), jnp.float32))
        idx = jnp.arange(Cg, dtype=jnp.float32)
        gamma = 0.8 + 0.1 * idx + 0.05 * i
        beta = 0.05 * idx - 0.02 * i
        mean = 0.01 * idx + 0.03 * i
        var = 1.0 + 0.1 * idx + 0.02 * i
        group_bns.append((gamma, beta, mean, var))

    w_cat = 0.3 * jax.random.normal(keys[4], (C, 2 * C), jnp.float32)
    idx = jnp.arange(C, dtype=jnp.float32)
    bn_cat = (1.0 - 0.03 * idx, 0.02 * idx, -0.01 * idx, 1.0 + 0.05 * idx)
    return group_ws, group_bns, w_cat, bn_cat


if __name__ == "__main__":
    key = jax.random.PRNGKey(0)
    kx, kp = jax.random.split(key)

    N, C, H, W = 2, CHANNEL, 16, 16
    x = jax.random.normal(kx, (N, C, H, W), jnp.float32)
    params = make_params(kp, C)

    out = jax.block_until_ready(psp_pooling_forward(x, params))
    ref = jax.block_until_ready(reference_forward(x, params))

    assert out.shape == (N, C, H, W)
    err = jnp.max(jnp.abs(out - ref))
    assert jnp.allclose(out, ref, rtol=1e-4, atol=1e-4), f"max abs err = {err}"

    print("KERNEL_OK")
</pallas_src>

<mosaic_0001>
module attributes {stable_mosaic.version = 11 : i64} {
  func.func @kernel(%arg0: i32, %arg1: memref<8x256xf32, #tpu.memory_space<vmem>>, %arg2: memref<4x8xf32, #tpu.memory_space<vmem>>, %arg3: memref<4x1xf32, #tpu.memory_space<vmem>>, %arg4: memref<8x256xf32, #tpu.memory_space<vmem>>) attributes {dimension_semantics = [#tpu.dimension_semantics<parallel>], iteration_bounds = array<i64: 1>, scalar_prefetch = 0 : i64, scratch_operands = 0 : i64, tpu.core_type = #tpu.core_type<tc>, window_params = [{transform_indices = @transform_0, window_bounds = array<i64: 8, 256>}, {pipeline_mode = #tpu.pipeline_mode<synchronous>, transform_indices = @transform_1, window_bounds = array<i64: 4, 8>}, {pipeline_mode = #tpu.pipeline_mode<synchronous>, transform_indices = @transform_2, window_bounds = array<i64: 4, 1>}, {transform_indices = @transform_3, window_bounds = array<i64: 8, 256>}]} {
    %c0 = arith.constant 0 : index
    %c0_0 = arith.constant 0 : index
    %0 = vector.load %arg1[%c0, %c0_0] : memref<8x256xf32, #tpu.memory_space<vmem>>, vector<8x256xf32>
    %1 = tpu.iota {dimensions = array<i32: 1>} : vector<8x256xi32>
    %2 = tpu.iota {dimensions = array<i32: 0>} : vector<8x256xi32>
    %c3_i32 = arith.constant 3 : i32
    %3 = vector.broadcast %c3_i32 : i32 to vector<8x256xi32>
    %4 = arith.andi %2, %3 : vector<8x256xi32>
    %c1_i32 = arith.constant 1 : i32
    %5 = vector.broadcast %c1_i32 : i32 to vector<8x256xi32>
    %6 = arith.cmpi sge, %4, %5 : vector<8x256xi32>
    %c1_i32_1 = arith.constant 1 : i32
    %7 = vector.broadcast %c1_i32_1 : i32 to vector<8x256xi32>
    %8 = arith.andi %1, %7 : vector<8x256xi32>
    %c0_i32 = arith.constant 0 : i32
    %9 = vector.broadcast %c0_i32 : i32 to vector<8x256xi32>
    %10 = arith.cmpi ne, %8, %9 : vector<8x256xi32>
    %c1_i32_2 = arith.constant 1 : i32
    %11 = tpu.dynamic_rotate %0 by %c1_i32_2 dim 1 : vector<8x256xf32>, i32 -> vector<8x256xf32>
    %c255_i32 = arith.constant 255 : i32
    %12 = tpu.dynamic_rotate %0 by %c255_i32 dim 1 : vector<8x256xf32>, i32 -> vector<8x256xf32>
    %13 = arith.select %10, %11, %12 : vector<8x256xi1>, vector<8x256xf32>
    %14 = arith.maximumf %0, %13 : vector<8x256xf32>
    %15 = arith.select %6, %14, %0 : vector<8x256xi1>, vector<8x256xf32>
    %c16_i32 = arith.constant 16 : i32
    %16 = vector.broadcast %c16_i32 : i32 to vector<8x256xi32>
    %17 = arith.andi %1, %16 : vector<8x256xi32>
    %c0_i32_3 = arith.constant 0 : i32
    %18 = vector.broadcast %c0_i32_3 : i32 to vector<8x256xi32>
    %19 = arith.cmpi ne, %17, %18 : vector<8x256xi32>
    %c16_i32_4 = arith.constant 16 : i32
    %20 = tpu.dynamic_rotate %15 by %c16_i32_4 dim 1 : vector<8x256xf32>, i32 -> vector<8x256xf32>
    %c240_i32 = arith.constant 240 : i32
    %21 = tpu.dynamic_rotate %15 by %c240_i32 dim 1 : vector<8x256xf32>, i32 -> vector<8x256xf32>
    %22 = arith.select %19, %20, %21 : vector<8x256xi1>, vector<8x256xf32>
    %23 = arith.maximumf %15, %22 : vector<8x256xf32>
    %24 = arith.select %6, %23, %15 : vector<8x256xi1>, vector<8x256xf32>
    %c2_i32 = arith.constant 2 : i32
    %25 = vector.broadcast %c2_i32 : i32 to vector<8x256xi32>
    %26 = arith.cmpi sge, %4, %25 : vector<8x256xi32>
    %c2_i32_5 = arith.constant 2 : i32
    %27 = vector.broadcast %c2_i32_5 : i32 to vector<8x256xi32>
    %28 = arith.andi %1, %27 : vector<8x256xi32>
    %c0_i32_6 = arith.constant 0 : i32
    %29 = vector.broadcast %c0_i32_6 : i32 to vector<8x256xi32>
    %30 = arith.cmpi ne, %28, %29 : vector<8x256xi32>
    %c2_i32_7 = arith.constant 2 : i32
    %31 = tpu.dynamic_rotate %24 by %c2_i32_7 dim 1 : vector<8x256xf32>, i32 -> vector<8x256xf32>
    %c254_i32 = arith.constant 254 : i32
    %32 = tpu.dynamic_rotate %24 by %c254_i32 dim 1 : vector<8x256xf32>, i32 -> vector<8x256xf32>
    %33 = arith.select %30, %31, %32 : vector<8x256xi1>, vector<8x256xf32>
    %34 = arith.maximumf %24, %33 : vector<8x256xf32>
    %35 = arith.select %26, %34, %24 : vector<8x256xi1>, vector<8x256xf32>
    %c32_i32 = arith.constant 32 : i32
    %36 = vector.broadcast %c32_i32 : i32 to vector<8x256xi32>
    %37 = arith.andi %1, %36 : vector<8x256xi32>
    %c0_i32_8 = arith.constant 0 : i32
    %38 = vector.broadcast %c0_i32_8 : i32 to vector<8x256xi32>
    %39 = arith.cmpi ne, %37, %38 : vector<8x256xi32>
    %c32_i32_9 = arith.constant 32 : i32
    %40 = tpu.dynamic_rotate %35 by %c32_i32_9 dim 1 : vector<8x256xf32>, i32 -> vector<8x256xf32>
    %c224_i32 = arith.constant 224 : i32
    %41 = tpu.dynamic_rotate %35 by %c224_i32 dim 1 : vector<8x256xf32>, i32 -> vector<8x256xf32>
    %42 = arith.select %39, %40, %41 : vector<8x256xi1>, vector<8x256xf32>
    %43 = arith.maximumf %35, %42 : vector<8x256xf32>
    %44 = arith.select %26, %43, %35 : vector<8x256xi1>, vector<8x256xf32>
    %c3_i32_10 = arith.constant 3 : i32
    %45 = vector.broadcast %c3_i32_10 : i32 to vector<8x256xi32>
    %46 = arith.cmpi sge, %4, %45 : vector<8x256xi32>
    %c4_i32 = arith.constant 4 : i32
    %47 = vector.broadcast %c4_i32 : i32 to vector<8x256xi32>
    %48 = arith.andi %1, %47 : vector<8x256xi32>
    %c0_i32_11 = arith.constant 0 : i32
    %49 = vector.broadcast %c0_i32_11 : i32 to vector<8x256xi32>
    %50 = arith.cmpi ne, %48, %49 : vector<8x256xi32>
    %c4_i32_12 = arith.constant 4 : i32
    %51 = tpu.dynamic_rotate %44 by %c4_i32_12 dim 1 : vector<8x256xf32>, i32 -> vector<8x256xf32>
    %c252_i32 = arith.constant 252 : i32
    %52 = tpu.dynamic_rotate %44 by %c252_i32 dim 1 : vector<8x256xf32>, i32 -> vector<8x256xf32>
    %53 = arith.select %50, %51, %52 : vector<8x256xi1>, vector<8x256xf32>
    %54 = arith.maximumf %44, %53 : vector<8x256xf32>
    %55 = arith.select %46, %54, %44 : vector<8x256xi1>, vector<8x256xf32>
    %c64_i32 = arith.constant 64 : i32
    %56 = vector.broadcast %c64_i32 : i32 to vector<8x256xi32>
    %57 = arith.andi %1, %56 : vector<8x256xi32>
    %c0_i32_13 = arith.constant 0 : i32
    %58 = vector.broadcast %c0_i32_13 : i32 to vector<8x256xi32>
    %59 = arith.cmpi ne, %57, %58 : vector<8x256xi32>
    %c64_i32_14 = arith.constant 64 : i32
    %60 = tpu.dynamic_rotate %55 by %c64_i32_14 dim 1 : vector<8x256xf32>, i32 -> vector<8x256xf32>
    %c192_i32 = arith.constant 192 : i32
    %61 = tpu.dynamic_rotate %55 by %c192_i32 dim 1 : vector<8x256xf32>, i32 -> vector<8x256xf32>
    %62 = arith.select %59, %60, %61 : vector<8x256xi1>, vector<8x256xf32>
    %63 = arith.maximumf %55, %62 : vector<8x256xf32>
    %64 = arith.select %46, %63, %55 : vector<8x256xi1>, vector<8x256xf32>
    %c0_15 = arith.constant 0 : index
    %c0_16 = arith.constant 0 : index
    %65 = vector.load %arg2[%c0_15, %c0_16] : memref<4x8xf32, #tpu.memory_space<vmem>>, vector<4x8xf32>
    %c0_17 = arith.constant 0 : index
    %c0_18 = arith.constant 0 : index
    %66 = vector.load %arg3[%c0_17, %c0_18] : memref<4x1xf32, #tpu.memory_space<vmem>>, vector<4x1xf32>
    %67 = vector.shape_cast %66 : vector<4x1xf32> to vector<4x1xf32>
    %68 = vector.broadcast %67 : vector<4x1xf32> to vector<4x256xf32>
    %69 = vector.extract_strided_slice %65 {offsets = [0, 0], sizes = [4, 1], strides = [1, 1]} : vector<4x8xf32> to vector<4x1xf32>
    %70 = vector.extract_strided_slice %64 {offsets = [0, 0], sizes = [1, 256], strides = [1, 1]} : vector<8x256xf32> to vector<1x256xf32>
    %71 = vector.broadcast %69 : vector<4x1xf32> to vector<4x256xf32>
    %72 = vector.broadcast %70 : vector<1x256xf32> to vector<4x256xf32>
    %73 = arith.mulf %71, %72 : vector<4x256xf32>
    %74 = arith.addf %68, %73 : vector<4x256xf32>
    %75 = vector.extract_strided_slice %65 {offsets = [0, 4], sizes = [4, 1], strides = [1, 1]} : vector<4x8xf32> to vector<4x1xf32>
    %76 = vector.extract_strided_slice %0 {offsets = [0, 0], sizes = [1, 256], strides = [1, 1]} : vector<8x256xf32> to vector<1x256xf32>
    %77 = vector.broadcast %75 : vector<4x1xf32> to vector<4x256xf32>
    %78 = vector.broadcast %76 : vector<1x256xf32> to vector<4x256xf32>
    %79 = arith.mulf %77, %78 : vector<4x256xf32>
    %80 = arith.addf %74, %79 : vector<4x256xf32>
    %81 = vector.extract_strided_slice %65 {offsets = [0, 1], sizes = [4, 1], strides = [1, 1]} : vector<4x8xf32> to vector<4x1xf32>
    %82 = vector.extract_strided_slice %64 {offsets = [1, 0], sizes = [1, 256], strides = [1, 1]} : vector<8x256xf32> to vector<1x256xf32>
    %83 = vector.broadcast %81 : vector<4x1xf32> to vector<4x256xf32>
    %84 = vector.broadcast %82 : vector<1x256xf32> to vector<4x256xf32>
    %85 = arith.mulf %83, %84 : vector<4x256xf32>
    %86 = arith.addf %80, %85 : vector<4x256xf32>
    %87 = vector.extract_strided_slice %65 {offsets = [0, 5], sizes = [4, 1], strides = [1, 1]} : vector<4x8xf32> to vector<4x1xf32>
    %88 = vector.extract_strided_slice %0 {offsets = [1, 0], sizes = [1, 256], strides = [1, 1]} : vector<8x256xf32> to vector<1x256xf32>
    %89 = vector.broadcast %87 : vector<4x1xf32> to vector<4x256xf32>
    %90 = vector.broadcast %88 : vector<1x256xf32> to vector<4x256xf32>
    %91 = arith.mulf %89, %90 : vector<4x256xf32>
    %92 = arith.addf %86, %91 : vector<4x256xf32>
    %93 = vector.extract_strided_slice %65 {offsets = [0, 2], sizes = [4, 1], strides = [1, 1]} : vector<4x8xf32> to vector<4x1xf32>
    %94 = vector.extract_strided_slice %64 {offsets = [2, 0], sizes = [1, 256], strides = [1, 1]} : vector<8x256xf32> to vector<1x256xf32>
    %95 = vector.broadcast %93 : vector<4x1xf32> to vector<4x256xf32>
    %96 = vector.broadcast %94 : vector<1x256xf32> to vector<4x256xf32>
    %97 = arith.mulf %95, %96 : vector<4x256xf32>
    %98 = arith.addf %92, %97 : vector<4x256xf32>
    %99 = vector.extract_strided_slice %65 {offsets = [0, 6], sizes = [4, 1], strides = [1, 1]} : vector<4x8xf32> to vector<4x1xf32>
    %100 = vector.extract_strided_slice %0 {offsets = [2, 0], sizes = [1, 256], strides = [1, 1]} : vector<8x256xf32> to vector<1x256xf32>
    %101 = vector.broadcast %99 : vector<4x1xf32> to vector<4x256xf32>
    %102 = vector.broadcast %100 : vector<1x256xf32> to vector<4x256xf32>
    %103 = arith.mulf %101, %102 : vector<4x256xf32>
    %104 = arith.addf %98, %103 : vector<4x256xf32>
    %105 = vector.extract_strided_slice %65 {offsets = [0, 3], sizes = [4, 1], strides = [1, 1]} : vector<4x8xf32> to vector<4x1xf32>
    %106 = vector.extract_strided_slice %64 {offsets = [3, 0], sizes = [1, 256], strides = [1, 1]} : vector<8x256xf32> to vector<1x256xf32>
    %107 = vector.broadcast %105 : vector<4x1xf32> to vector<4x256xf32>
    %108 = vector.broadcast %106 : vector<1x256xf32> to vector<4x256xf32>
    %109 = arith.mulf %107, %108 : vector<4x256xf32>
    %110 = arith.addf %104, %109 : vector<4x256xf32>
    %111 = vector.extract_strided_slice %65 {offsets = [0, 7], sizes = [4, 1], strides = [1, 1]} : vector<4x8xf32> to vector<4x1xf32>
    %112 = vector.extract_strided_slice %0 {offsets = [3, 0], sizes = [1, 256], strides = [1, 1]} : vector<8x256xf32> to vector<1x256xf32>
    %113 = vector.broadcast %111 : vector<4x1xf32> to vector<4x256xf32>
    %114 = vector.broadcast %112 : vector<1x256xf32> to vector<4x256xf32>
    %115 = arith.mulf %113, %114 : vector<4x256xf32>
    %116 = arith.addf %110, %115 : vector<4x256xf32>
    %c0_19 = arith.constant 0 : index
    %c0_20 = arith.constant 0 : index
    %117 = vector.load %arg4[%c0_19, %c0_20] : memref<8x256xf32, #tpu.memory_space<vmem>>, vector<4x256xf32>
    tpu.vector_store %arg4[%c0_19, %c0_20], %116 {strides = array<i32>} : memref<8x256xf32, #tpu.memory_space<vmem>>, vector<4x256xf32>,
    %118 = vector.extract_strided_slice %65 {offsets = [0, 0], sizes = [4, 1], strides = [1, 1]} : vector<4x8xf32> to vector<4x1xf32>
    %119 = vector.extract_strided_slice %64 {offsets = [4, 0], sizes = [1, 256], strides = [1, 1]} : vector<8x256xf32> to vector<1x256xf32>
    %120 = vector.broadcast %118 : vector<4x1xf32> to vector<4x256xf32>
    %121 = vector.broadcast %119 : vector<1x256xf32> to vector<4x256xf32>
    %122 = arith.mulf %120, %121 : vector<4x256xf32>
    %123 = arith.addf %68, %122 : vector<4x256xf32>
    %124 = vector.extract_strided_slice %65 {offsets = [0, 4], sizes = [4, 1], strides = [1, 1]} : vector<4x8xf32> to vector<4x1xf32>
    %125 = vector.extract_strided_slice %0 {offsets = [4, 0], sizes = [1, 256], strides = [1, 1]} : vector<8x256xf32> to vector<1x256xf32>
    %126 = vector.broadcast %124 : vector<4x1xf32> to vector<4x256xf32>
    %127 = vector.broadcast %125 : vector<1x256xf32> to vector<4x256xf32>
    %128 = arith.mulf %126, %127 : vector<4x256xf32>
    %129 = arith.addf %123, %128 : vector<4x256xf32>
    %130 = vector.extract_strided_slice %65 {offsets = [0, 1], sizes = [4, 1], strides = [1, 1]} : vector<4x8xf32> to vector<4x1xf32>
    %131 = vector.extract_strided_slice %64 {offsets = [5, 0], sizes = [1, 256], strides = [1, 1]} : vector<8x256xf32> to vector<1x256xf32>
    %132 = vector.broadcast %130 : vector<4x1xf32> to vector<4x256xf32>
    %133 = vector.broadcast %131 : vector<1x256xf32> to vector<4x256xf32>
    %134 = arith.mulf %132, %133 : vector<4x256xf32>
    %135 = arith.addf %129, %134 : vector<4x256xf32>
    %136 = vector.extract_strided_slice %65 {offsets = [0, 5], sizes = [4, 1], strides = [1, 1]} : vector<4x8xf32> to vector<4x1xf32>
    %137 = vector.extract_strided_slice %0 {offsets = [5, 0], sizes = [1, 256], strides = [1, 1]} : vector<8x256xf32> to vector<1x256xf32>
    %138 = vector.broadcast %136 : vector<4x1xf32> to vector<4x256xf32>
    %139 = vector.broadcast %137 : vector<1x256xf32> to vector<4x256xf32>
    %140 = arith.mulf %138, %139 : vector<4x256xf32>
    %141 = arith.addf %135, %140 : vector<4x256xf32>
    %142 = vector.extract_strided_slice %65 {offsets = [0, 2], sizes = [4, 1], strides = [1, 1]} : vector<4x8xf32> to vector<4x1xf32>
    %143 = vector.extract_strided_slice %64 {offsets = [6, 0], sizes = [1, 256], strides = [1, 1]} : vector<8x256xf32> to vector<1x256xf32>
    %144 = vector.broadcast %142 : vector<4x1xf32> to vector<4x256xf32>
    %145 = vector.broadcast %143 : vector<1x256xf32> to vector<4x256xf32>
    %146 = arith.mulf %144, %145 : vector<4x256xf32>
    %147 = arith.addf %141, %146 : vector<4x256xf32>
    %148 = vector.extract_strided_slice %65 {offsets = [0, 6], sizes = [4, 1], strides = [1, 1]} : vector<4x8xf32> to vector<4x1xf32>
    %149 = vector.extract_strided_slice %0 {offsets = [6, 0], sizes = [1, 256], strides = [1, 1]} : vector<8x256xf32> to vector<1x256xf32>
    %150 = vector.broadcast %148 : vector<4x1xf32> to vector<4x256xf32>
    %151 = vector.broadcast %149 : vector<1x256xf32> to vector<4x256xf32>
    %152 = arith.mulf %150, %151 : vector<4x256xf32>
    %153 = arith.addf %147, %152 : vector<4x256xf32>
    %154 = vector.extract_strided_slice %65 {offsets = [0, 3], sizes = [4, 1], strides = [1, 1]} : vector<4x8xf32> to vector<4x1xf32>
    %155 = vector.extract_strided_slice %64 {offsets = [7, 0], sizes = [1, 256], strides = [1, 1]} : vector<8x256xf32> to vector<1x256xf32>
    %156 = vector.broadcast %154 : vector<4x1xf32> to vector<4x256xf32>
    %157 = vector.broadcast %155 : vector<1x256xf32> to vector<4x256xf32>
    %158 = arith.mulf %156, %157 : vector<4x256xf32>
    %159 = arith.addf %153, %158 : vector<4x256xf32>
    %160 = vector.extract_strided_slice %65 {offsets = [0, 7], sizes = [4, 1], strides = [1, 1]} : vector<4x8xf32> to vector<4x1xf32>
    %161 = vector.extract_strided_slice %0 {offsets = [7, 0], sizes = [1, 256], strides = [1, 1]} : vector<8x256xf32> to vector<1x256xf32>
    %162 = vector.broadcast %160 : vector<4x1xf32> to vector<4x256xf32>
    %163 = vector.broadcast %161 : vector<1x256xf32> to vector<4x256xf32>
    %164 = arith.mulf %162, %163 : vector<4x256xf32>
    %165 = arith.addf %159, %164 : vector<4x256xf32>
    %c4 = arith.constant 4 : index
    %c0_21 = arith.constant 0 : index
    %166 = vector.load %arg4[%c4, %c0_21] : memref<8x256xf32, #tpu.memory_space<vmem>>, vector<4x256xf32>
    tpu.vector_store %arg4[%c4, %c0_21], %165 {strides = array<i32>} : memref<8x256xf32, #tpu.memory_space<vmem>>, vector<4x256xf32>,
    return
  }
  func.func @transform_0(%arg0: i32) -> (i32, i32) {
    %c0_i32 = arith.constant 0 : i32
    %c0_i32_0 = arith.constant 0 : i32
    return %arg0, %c0_i32 : i32, i32
  }
  func.func @transform_1(%arg0: i32) -> (i32, i32) {
    %c0_i32 = arith.constant 0 : i32
    %c0_i32_0 = arith.constant 0 : i32
    %c0_i32_1 = arith.constant 0 : i32
    return %c0_i32, %c0_i32_0 : i32, i32
  }
  func.func @transform_2(%arg0: i32) -> (i32, i32) {
    %c0_i32 = arith.constant 0 : i32
    %c0_i32_0 = arith.constant 0 : i32
    %c0_i32_1 = arith.constant 0 : i32
    return %c0_i32, %c0_i32_0 : i32, i32
  }
  func.func @transform_3(%arg0: i32) -> (i32, i32) {
    %c0_i32 = arith.constant 0 : i32
    %c0_i32_0 = arith.constant 0 : i32
    return %arg0, %c0_i32 : i32, i32
  }
}

</mosaic_0001>

<bundles_post_ra>
// kernel: tpu_custom_call.1
= control target key start
LH: loop header
LB: loop body
LE: loop exit
PB: predicated region body
PF: predicated region fallthrough
CT: control target
= control target key end

     0   :  { %8 = vsyncpa [#allocation3], 0  ;;  %s738_s0 = inlined_call_operand.hbm [shape: f32[8,256], index: 0, kind: input, shape index: {}]   ;;  %s739_s1 = inlined_call_operand.vmem [shape: f32[4,8], index: 1, kind: input, shape index: {}]   ;;  %s740_s2 = inlined_call_operand.vmem [shape: f32[4,1], index: 2, kind: input, shape index: {}]   ;;  %s741_s3 = inlined_call_operand.hbm [shape: f32[8,256], index: 3, kind: output, shape index: {}]  }
   0x1   :  { %9 = vsyncpa [#allocation4], 0  ;;  %s511_s12 = smov [#allocation2]   ;;  %s463_s16 = scalar_lea.hbm %s738_s0, 256 }
   0x2   :  { %s16_s13 = sshll.u32 %s511_s12, 4  ;;  %p464_p0 = scmp.ne.s32.totalorder %s738_s0, %s463_s16  ;;  %s17_s13 = int_to_ptr.vmem [resolvable:$true] %s16_s13 }
   0x3   :  { %p467_p1 = scmp.lt.u32.totalorder %s463_s16, %s738_s0 }
   0x5   :  { %p469_p2 = pnand %p467_p1, %p464_p0 }
   0x7   :  { %472 = shalt.err (!%p469_p2)
}
   0x8   :  { %s473_s21 = scalar_lea.vmem %s17_s13, 256  ;;  %p478_p4 = scmp.lt.s32.totalorder %s17_s13, %s17_s13 }
   0x9   :  { %p474_p3 = scmp.ne.s32.totalorder %s17_s13, %s473_s21  ;;  %p479_p5 = scmp.lt.s32.totalorder %s473_s21, %s473_s21 }
   0xb   :  { %p480_p6 = por %p479_p5, %p478_p4 }
   0xd   :  { %p481_p7 = pnand %p480_p6, %p474_p3 }
   0xf   :  { %484 = shalt.err (!%p481_p7)
}
  0x10   :  { %19 = dma.hbm_to_vmem [thread:$0]  %s738_s0, 256, %s17_s13, [#allocation3]  }
  0x11   :  { %507 = dma.done.wait [#allocation3], 256  }
  0x12   :  { %508 = vsyncadd [#allocation3], 4294967040  ;;  %v564_v0 = vld [vmem:[#allocation2] sm:$0xff]  ;;  %s512_s24 = smov 127   ;;  %s513_s25 = smov 1   ;;  %v568_v1 = vld [vmem:[#allocation2 + $0x8] sm:$0xff]  ;;  %v29_v2 = vlaneseq }
  0x13   :  { %47 = vrot.lane.b32.xlu1 %v564_v0, %s512_s24  ;;  %40 = vrot.lane.b32.xlu0 %v564_v0, %s513_s25  ;;  %s514_s0 = smov 16   ;;  %s515_s26 = smov 112   ;;  %v519_v55 = vmov 0  }
  0x14   :  { %v572_v3 = vand.u32 127, %v29_v2  ;;  %v577_v5 = vshrl.u32 %v29_v2, 7  ;;  %s516_s27 = smov 2   ;;  %s517_s28 = smov 126   ;;  %454 = vset.pattern.permute.xlu1 %v519_v55  ;;  %453 = vset.pattern.permute.xlu0 %v519_v55 }
  0x15   :  { %s518_s29 = smov 32   ;;  %s520_s30 = smov 96  }
  0x16   :  { %v575_v4 = vadd.s32 128, %v572_v3  ;;  %v36_v6 = vand.u32 1, %v572_v3  ;;  %vm51_vm0 = vcmp.lt.s32.totalorder %v572_v3, 127  ;;  %vm44_vm1 = vcmp.lt.s32.totalorder %v572_v3, 1  ;;  %s521_s4 = smov 4   ;;  %s522_s5 = smov 124  }
  0x17   :  { %49 = vrot.lane.b32.xlu1 %v568_v1, %s512_s24  ;;  %42 = vrot.lane.b32.xlu0 %v568_v1, %s513_s25  ;;  %v584_v10 = vand.u32 3, %v577_v5  ;;  %v60_v23 = vand.u32 16, %v572_v3  ;;  %vm68_vm5 = vcmp.lt.s32.totalorder %v572_v3, 16  ;;  %vm75_vm6 = vcmp.lt.s32.totalorder %v572_v3, 112 }
  0x18   :  { %v37_v7 = vand.u32 1, %v575_v4  ;;  %vm38_vm2 = vcmp.ne.s32.totalorder %v36_v6, 0  ;;  %v61_v24 = vand.u32 16, %v575_v4  ;;  %v85_v39 = vand.u32 2, %v572_v3 }
  0x19   :  { %vm35_vm4 = vcmp.ge.s32.totalorder %v584_v10, 1  ;;  %vm62_vm7 = vcmp.ne.s32.totalorder %v60_v23, 0  ;;  %v86_v40 = vand.u32 2, %v575_v4  ;;  %vm93_vm9 = vcmp.lt.s32.totalorder %v572_v3, 2 }
  0x1a   :  { %vm39_vm3 = vcmp.ne.s32.totalorder %v37_v7, 0  ;;  %vm63_vm8 = vcmp.ne.s32.totalorder %v61_v24, 0  ;;  %vm100_vm10 = vcmp.lt.s32.totalorder %v572_v3, 126  ;;  %vm87_vm11 = vcmp.ne.s32.totalorder %v85_v39, 0 }
  0x1b   :  { %vm88_vm12 = vcmp.ne.s32.totalorder %v86_v40, 0  ;;  %vm84_vm13 = vcmp.ge.s32.totalorder %v584_v10, 2  ;;  %v109_v56 = vand.u32 32, %v572_v3  ;;  %v110_v57 = vand.u32 32, %v575_v4 }
  0x1c   :  { %vm117_vm14 = vcmp.lt.s32.totalorder %v572_v3, 32  ;;  %vm124_vm15 = vcmp.lt.s32.totalorder %v572_v3, 96 }
  0x85   :  { %v48_v8 = vpop.permute.xlu1 %47  ;;  %v41_v9 = vpop.permute.xlu0 %40 }
  0x89   :  { %v50_v11 = vpop.permute.xlu1 %49  ;;  %v43_v12 = vpop.permute.xlu0 %42 }
  0x8a   :  { %v52_v13 = vsel %vm51_vm0, %v48_v8, %v50_v11  ;;  %v53_v14 = vsel %vm51_vm0, %v50_v11, %v48_v8  ;;  %v45_v15 = vsel %vm44_vm1, %v41_v9, %v43_v12  ;;  %v46_v16 = vsel %vm44_vm1, %v43_v12, %v41_v9 }
  0x8b   :  { %v54_v17 = vsel %vm38_vm2, %v46_v16, %v52_v13  ;;  %v55_v18 = vsel %vm39_vm3, %v45_v15, %v53_v14  ;;  %vm111_vm0 = vcmp.ne.s32.totalorder %v109_v56, 0  ;;  %vm112_vm1 = vcmp.ne.s32.totalorder %v110_v57, 0  ;;  %v176_v14 = vld [vmem:[%s740_s2] sm:$0xf]  ;;  %s531_s2 = smov [#allocation5]  }
  0x8c   :  { %v56_v19 = vmax.f32 %v564_v0, %v54_v17  ;;  %v57_v20 = vmax.f32 %v568_v1, %v55_v18  ;;  %v175_v15 = vld [vmem:[%s739_s1] sm:$0xf]  ;;  %v523_v16 = vmov 4   ;;  %v524_v17 = vmov 1   ;;  %s526_s1 = smov 64   ;;  %s423_s10 = sshll.u32 %s531_s2, 4  ;;  %s424_s10 = int_to_ptr.vmem [resolvable:$true] %s423_s10 }
  0x8d   :  { %v525_v18 = vmov 5   ;;  %vm142_vm2 = vcmp.lt.s32.totalorder %v572_v3, 4  ;;  %vm149_vm3 = vcmp.lt.s32.totalorder %v572_v3, 124  ;;  %s485_s11 = scalar_lea.vmem %s424_s10, 256  ;;  %p490_p9 = scmp.lt.s32.totalorder %s424_s10, %s424_s10 }
  0x8e   :  { %v58_v21 = vsel %vm35_vm4, %v56_v19, %v564_v0  ;;  %v59_v22 = vsel %vm35_vm4, %v57_v20, %v568_v1  ;;  %v134_v19 = vand.u32 4, %v572_v3  ;;  %v135_v20 = vand.u32 4, %v575_v4  ;;  %p486_p8 = scmp.ne.s32.totalorder %s424_s10, %s485_s11  ;;  %p491_p10 = scmp.lt.s32.totalorder %s485_s11, %s485_s11 }
  0x8f   :  { %64 = vrot.lane.b32.xlu0 %v58_v21, %s514_s0  ;;  %66 = vrot.lane.b32.xlu1 %v59_v22, %s514_s0 }
  0x90   :  { %p492_p11 = por %p491_p10, %p490_p9 }
  0x92   :  { %p493_p12 = pnand %p492_p11, %p486_p8 }
  0x93   :  { %71 = vrot.lane.b32.xlu0 %v58_v21, %s515_s26  ;;  %73 = vrot.lane.b32.xlu1 %v59_v22, %s515_s26 }
 0x101   :  { %v65_v25 = vpop.permute.xlu0 %64  ;;  %v67_v26 = vpop.permute.xlu1 %66 }
 0x102   :  { %v69_v29 = vsel %vm68_vm5, %v65_v25, %v67_v26  ;;  %v70_v30 = vsel %vm68_vm5, %v67_v26, %v65_v25  ;;  %vm137_vm5 = vcmp.ne.s32.totalorder %v135_v20, 0 }
 0x105   :  { %v72_v27 = vpop.permute.xlu0 %71  ;;  %v74_v28 = vpop.permute.xlu1 %73 }
 0x106   :  { %v76_v31 = vsel %vm75_vm6, %v72_v27, %v74_v28  ;;  %v77_v32 = vsel %vm75_vm6, %v74_v28, %v72_v27  ;;  %vm133_vm6 = vcmp.ge.s32.totalorder %v584_v10, 3  ;;  %v221_v10 = vsub.s32 1, %v577_v5 }
 0x107   :  { %v78_v33 = vsel %vm62_vm7, %v70_v30, %v76_v31  ;;  %v79_v34 = vsel %vm63_vm8, %v69_v29, %v77_v32  ;;  %vm166_vm7 = vcmp.lt.s32.totalorder %v572_v3, 64 }
 0x108   :  { %v80_v35 = vmax.f32 %v58_v21, %v78_v33  ;;  %v81_v36 = vmax.f32 %v59_v22, %v79_v34 }
 0x10a   :  { %v83_v37 = vsel %vm35_vm4, %v81_v36, %v568_v1  ;;  %v82_v38 = vsel %vm35_vm4, %v80_v35, %v564_v0  ;;  %vm136_vm4 = vcmp.ne.s32.totalorder %v134_v19, 0  ;;  %v527_v35 = vmov 2  }
 0x10b   :  { %91 = vrot.lane.b32.xlu1 %v83_v37, %s516_s27  ;;  %89 = vrot.lane.b32.xlu0 %v82_v38, %s516_s27  ;;  %v528_v36 = vmov 6  }
 0x10f   :  { %98 = vrot.lane.b32.xlu1 %v83_v37, %s517_s28  ;;  %96 = vrot.lane.b32.xlu0 %v82_v38, %s517_s28 }
 0x17d   :  { %v92_v41 = vpop.permute.xlu1 %91  ;;  %v90_v42 = vpop.permute.xlu0 %89 }
 0x17e   :  { %v94_v45 = vsel %vm93_vm9, %v90_v42, %v92_v41  ;;  %v95_v46 = vsel %vm93_vm9, %v92_v41, %v90_v42  ;;  %v158_v42 = vand.u32 64, %v572_v3 }
 0x180   :  { %vm160_vm8 = vcmp.ne.s32.totalorder %v158_v42, 0 }
 0x181   :  { %v99_v43 = vpop.permute.xlu1 %98  ;;  %v97_v44 = vpop.permute.xlu0 %96 }
 0x182   :  { %v101_v47 = vsel %vm100_vm10, %v97_v44, %v99_v43  ;;  %v102_v48 = vsel %vm100_vm10, %v99_v43, %v97_v44  ;;  %v159_v43 = vand.u32 64, %v575_v4 }
 0x183   :  { %v103_v49 = vsel %vm87_vm11, %v95_v46, %v101_v47  ;;  %v104_v50 = vsel %vm88_vm12, %v94_v45, %v102_v48  ;;  %v189_v48 = vsub.s32 0, %v577_v5 }
 0x184   :  { %v105_v51 = vmax.f32 %v82_v38, %v103_v49  ;;  %v106_v52 = vmax.f32 %v83_v37, %v104_v50  ;;  %vm161_vm9 = vcmp.ne.s32.totalorder %v159_v43, 0 }
 0x186   :  { %v108_v53 = vsel %vm84_vm13, %v106_v52, %v83_v37  ;;  %v107_v54 = vsel %vm84_vm13, %v105_v51, %v82_v38  ;;  %v315_v51 = vsub.s32 4, %v577_v5 }
 0x187   :  { %115 = vrot.lane.b32.xlu1 %v108_v53, %s518_s29  ;;  %113 = vrot.lane.b32.xlu0 %v107_v54, %s518_s29 }
 0x18b   :  { %122 = vrot.lane.b32.xlu1 %v108_v53, %s520_s30  ;;  %120 = vrot.lane.b32.xlu0 %v107_v54, %s520_s30 }
 0x1f9   :  { %v116_v58 = vpop.permute.xlu1 %115  ;;  %v114_v59 = vpop.permute.xlu0 %113 }
 0x1fa   :  { %v118_v62 = vsel %vm117_vm14, %v114_v59, %v116_v58  ;;  %v119_v63 = vsel %vm117_vm14, %v116_v58, %v114_v59  ;;  %v210_v58 = vrot.slane %v568_v1, %v189_v48  ;;  %v332_v59 = vrot.slane %v568_v1, %v315_v51 }
 0x1fd   :  { %v123_v60 = vpop.permute.xlu1 %122  ;;  %v121_v61 = vpop.permute.xlu0 %120 }
 0x1fe   :  { %v125_v2 = vsel %vm124_vm15, %v121_v61, %v123_v60  ;;  %v126_v6 = vsel %vm124_vm15, %v123_v60, %v121_v61  ;;  %v206_v60 = vrot.slane %v564_v0, %v189_v48  ;;  %v328_v61 = vrot.slane %v564_v0, %v315_v51 }
 0x1ff   :  { %v127_v7 = vsel %vm111_vm0, %v119_v63, %v125_v2  ;;  %v128_v8 = vsel %vm112_vm1, %v118_v62, %v126_v6  ;;  %v339_v62 = vsub.s32 5, %v577_v5 }
 0x200   :  { %v129_v9 = vmax.f32 %v107_v54, %v127_v7  ;;  %v130_v11 = vmax.f32 %v108_v53, %v128_v8  ;;  %v242_v8 = vrot.slane %v568_v1, %v221_v10 }
 0x202   :  { %v620_v12 = vsel %vm84_vm13, %v130_v11, %v83_v37  ;;  %v624_v13 = vsel %vm84_vm13, %v129_v9, %v82_v38  ;;  %v529_v37 = vmov 3   ;;  %v530_v38 = vmov 7  }
 0x203   :  { %140 = vrot.lane.b32.xlu1 %v620_v12, %s521_s4  ;;  %138 = vrot.lane.b32.xlu0 %v624_v13, %s521_s4  ;;  %v356_v9 = vrot.slane %v568_v1, %v339_v62  ;;  %v253_v11 = vsub.s32 2, %v577_v5 }
 0x205   :  { %v270_v19 = vrot.slane %v564_v0, %v253_v11 }
 0x207   :  { %147 = vrot.lane.b32.xlu1 %v620_v12, %s522_s5  ;;  %145 = vrot.lane.b32.xlu0 %v624_v13, %s522_s5 }
 0x20b   :  { %179 = vperm.xlu1 %454, %v176_v14   ;;  %184 = vperm.xlu0 %453, %v175_v15   ;;  %v352_v14 = vrot.slane %v564_v0, %v339_v62 }
 0x20f   :  { %455 = vset.pattern.permute.xlu1 %v523_v16  ;;  %456 = vset.pattern.permute.xlu0 %v524_v17  ;;  %v684_v16 = vsub.s32 7, %v577_v5  ;;  %v274_v17 = vrot.slane %v568_v1, %v253_v11 }
 0x210   :  { %200 = vperm.xlu1 %455, %v175_v15  }
 0x214   :  { %457 = vset.pattern.permute.xlu1 %v525_v18 }
 0x275   :  { %v141_v21 = vpop.permute.xlu1 %140  ;;  %v139_v22 = vpop.permute.xlu0 %138 }
 0x276   :  { %v143_v25 = vsel %vm142_vm2, %v139_v22, %v141_v21  ;;  %v144_v26 = vsel %vm142_vm2, %v141_v21, %v139_v22 }
 0x279   :  { %v148_v23 = vpop.permute.xlu1 %147  ;;  %v146_v24 = vpop.permute.xlu0 %145 }
 0x27a   :  { %v150_v27 = vsel %vm149_vm3, %v146_v24, %v148_v23  ;;  %v151_v28 = vsel %vm149_vm3, %v148_v23, %v146_v24 }
 0x27b   :  { %v152_v29 = vsel %vm136_vm4, %v144_v26, %v150_v27  ;;  %v153_v30 = vsel %vm137_vm5, %v143_v25, %v151_v28 }
 0x27c   :  { %v154_v31 = vmax.f32 %v624_v13, %v152_v29  ;;  %v155_v32 = vmax.f32 %v620_v12, %v153_v30 }
 0x27e   :  { %v157_v33 = vsel %vm133_vm6, %v155_v32, %v620_v12  ;;  %v156_v34 = vsel %vm133_vm6, %v154_v31, %v624_v13  ;;  %v400_v31 = vrot.slane %v564_v0, %v684_v16 }
 0x27f   :  { %164 = vrot.lane.b32.xlu1 %v157_v33, %s526_s1  ;;  %162 = vrot.lane.b32.xlu0 %v156_v34, %s526_s1 }
 0x283   :  { %232 = vperm.xlu1 %457, %v175_v15   ;;  %216 = vperm.xlu0 %456, %v175_v15  }
 0x287   :  { %458 = vset.pattern.permute.xlu1 %v527_v35  ;;  %459 = vset.pattern.permute.xlu0 %v528_v36 }
 0x288   :  { %248 = vperm.xlu1 %458, %v175_v15   ;;  %264 = vperm.xlu0 %459, %v175_v15  }
 0x28a   :  { %v180_v39 = vpop.permute.xlu1 %179  ;;  %v185_v41 = vpop.permute.xlu0 %184 }
 0x28c   :  { %460 = vset.pattern.permute.xlu1 %v529_v37  ;;  %462 = vset.pattern.permute.xlu0 %v530_v38 }
 0x28d   :  { %280 = vperm.xlu1 %460, %v175_v15  }
 0x28f   :  { %v201_v40 = vpop.permute.xlu1 %200 }
 0x290   :  { %v211_v25 = vmul.f32 %v206_v60, %v201_v40  ;;  %v212_v26 = vmul.f32 %v210_v58, %v201_v40  ;;  %v333_v28 = vmul.f32 %v328_v61, %v201_v40  ;;  %v334_v29 = vmul.f32 %v332_v59, %v201_v40 }
 0x291   :  { %461 = vset.pattern.permute.xlu1 %v530_v38 }
 0x292   :  { %296 = vperm.xlu1 %461, %v175_v15   ;;  %v681_v15 = vsub.s32 3, %v577_v5 }
 0x294   :  { %v306_v27 = vrot.slane %v568_v1, %v681_v15  ;;  %v302_v30 = vrot.slane %v564_v0, %v681_v15 }
 0x2f1   :  { %v165_v44 = vpop.permute.xlu1 %164  ;;  %v163_v45 = vpop.permute.xlu0 %162 }
 0x2f2   :  { %v167_v46 = vsel %vm166_vm7, %v163_v45, %v165_v44  ;;  %v168_v47 = vsel %vm166_vm7, %v165_v44, %v163_v45 }
 0x2f3   :  { %v169_v49 = vsel %vm160_vm8, %v168_v47, %v167_v46  ;;  %v170_v50 = vsel %vm161_vm9, %v167_v46, %v168_v47 }
 0x2f4   :  { %v171_v52 = vmax.f32 %v156_v34, %v169_v49  ;;  %v172_v53 = vmax.f32 %v157_v33, %v170_v50 }
 0x2f6   :  { %v657_v4 = vsel %vm133_vm6, %v171_v52, %v624_v13  ;;  %v662_v3 = vsel %vm133_vm6, %v172_v53, %v620_v12  ;;  %v363_v12 = vsub.s32 6, %v577_v5  ;;  %v238_v13 = vrot.slane %v564_v0, %v221_v10 }
 0x2f7   :  { %v190_v54 = vrot.slane %v657_v4, %v189_v48  ;;  %v194_v55 = vrot.slane %v662_v3, %v189_v48  ;;  %v316_v56 = vrot.slane %v657_v4, %v315_v51  ;;  %v320_v57 = vrot.slane %v662_v3, %v315_v51 }
 0x2f8   :  { %v380_v18 = vrot.slane %v568_v1, %v363_v12  ;;  %v376_v20 = vrot.slane %v564_v0, %v363_v12  ;;  %v404_v5 = vrot.slane %v568_v1, %v684_v16  ;;  %v222_v33 = vrot.slane %v657_v4, %v221_v10 }
 0x2f9   :  { %v195_v63 = vmul.f32 %v190_v54, %v185_v41  ;;  %v196_v2 = vmul.f32 %v194_v55, %v185_v41  ;;  %v321_v6 = vmul.f32 %v316_v56, %v185_v41  ;;  %v322_v7 = vmul.f32 %v320_v57, %v185_v41 }
 0x2fa   :  { %v226_v34 = vrot.slane %v662_v3, %v221_v10  ;;  %v340_v35 = vrot.slane %v657_v4, %v339_v62  ;;  %v344_v36 = vrot.slane %v662_v3, %v339_v62  ;;  %v254_v46 = vrot.slane %v657_v4, %v253_v11 }
 0x2fb   :  { %v197_v21 = vadd.f32 %v195_v63, %v180_v39  ;;  %v198_v22 = vadd.f32 %v196_v2, %v180_v39  ;;  %v323_v23 = vadd.f32 %v321_v6, %v180_v39  ;;  %v324_v24 = vadd.f32 %v322_v7, %v180_v39 }
 0x2fc   :  { %v258_v47 = vrot.slane %v662_v3, %v253_v11  ;;  %v364_v48 = vrot.slane %v657_v4, %v363_v12  ;;  %v368_v49 = vrot.slane %v662_v3, %v363_v12 }
 0x2fd   :  { %v214_v38 = vadd.f32 %v212_v26, %v198_v22  ;;  %v336_v39 = vadd.f32 %v334_v29, %v324_v24  ;;  %v213_v41 = vadd.f32 %v211_v25, %v197_v21  ;;  %v335_v40 = vadd.f32 %v333_v28, %v323_v23 }
 0x2fe   :  { %v290_v25 = vrot.slane %v662_v3, %v681_v15  ;;  %v388_v26 = vrot.slane %v657_v4, %v684_v16 }
 0x302   :  { %v233_v32 = vpop.permute.xlu1 %232  ;;  %v217_v37 = vpop.permute.xlu0 %216 }
 0x303   :  { %v227_v42 = vmul.f32 %v222_v33, %v217_v37  ;;  %v228_v43 = vmul.f32 %v226_v34, %v217_v37  ;;  %v345_v44 = vmul.f32 %v340_v35, %v217_v37  ;;  %v346_v45 = vmul.f32 %v344_v36, %v217_v37 }
 0x304   :  { %v243_v54 = vmul.f32 %v238_v13, %v233_v32  ;;  %v244_v55 = vmul.f32 %v242_v8, %v233_v32  ;;  %v357_v56 = vmul.f32 %v352_v14, %v233_v32  ;;  %v358_v57 = vmul.f32 %v356_v9, %v233_v32 }
 0x305   :  { %v229_v50 = vadd.f32 %v227_v42, %v213_v41  ;;  %v230_v51 = vadd.f32 %v228_v43, %v214_v38  ;;  %v347_v52 = vadd.f32 %v345_v44, %v335_v40  ;;  %v348_v53 = vadd.f32 %v346_v45, %v336_v39 }
 0x306   :  { %v286_v8 = vrot.slane %v657_v4, %v681_v15 }
 0x307   :  { %v249_v58 = vpop.permute.xlu1 %248  ;;  %v265_v59 = vpop.permute.xlu0 %264  ;;  %v246_v63 = vadd.f32 %v244_v55, %v230_v51  ;;  %v360_v2 = vadd.f32 %v358_v57, %v348_v53  ;;  %v245_v6 = vadd.f32 %v243_v54, %v229_v50  ;;  %v359_v12 = vadd.f32 %v357_v56, %v347_v52 }
 0x308   :  { %v259_v60 = vmul.f32 %v254_v46, %v249_v58  ;;  %v260_v61 = vmul.f32 %v258_v47, %v249_v58  ;;  %v369_v10 = vmul.f32 %v364_v48, %v249_v58  ;;  %v370_v62 = vmul.f32 %v368_v49, %v249_v58 }
 0x309   :  { %v275_v7 = vmul.f32 %v270_v19, %v265_v59  ;;  %v276_v11 = vmul.f32 %v274_v17, %v265_v59  ;;  %v381_v21 = vmul.f32 %v376_v20, %v265_v59  ;;  %v382_v22 = vmul.f32 %v380_v18, %v265_v59 }
 0x30a   :  { %v262_v23 = vadd.f32 %v260_v61, %v246_v63  ;;  %v372_v24 = vadd.f32 %v370_v62, %v360_v2  ;;  %v261_v13 = vadd.f32 %v259_v60, %v245_v6  ;;  %v371_v9 = vadd.f32 %v369_v10, %v359_v12 }
 0x30b   :  { %v392_v17 = vrot.slane %v662_v3, %v684_v16 }
 0x30c   :  { %v281_v14 = vpop.permute.xlu1 %280  ;;  %v277_v19 = vadd.f32 %v275_v7, %v261_v13  ;;  %v278_v20 = vadd.f32 %v276_v11, %v262_v23  ;;  %v384_v18 = vadd.f32 %v382_v22, %v372_v24  ;;  %v383_v29 = vadd.f32 %v381_v21, %v371_v9 }
 0x30d   :  { %v291_v28 = vmul.f32 %v286_v8, %v281_v14  ;;  %v292_v32 = vmul.f32 %v290_v25, %v281_v14  ;;  %v393_v33 = vmul.f32 %v388_v26, %v281_v14  ;;  %v394_v34 = vmul.f32 %v392_v17, %v281_v14 }
 0x30f   :  { %v293_v36 = vadd.f32 %v291_v28, %v277_v19  ;;  %v294_v37 = vadd.f32 %v292_v32, %v278_v20  ;;  %v395_v38 = vadd.f32 %v393_v33, %v383_v29  ;;  %v396_v39 = vadd.f32 %v394_v34, %v384_v18 }
 0x311   :  { %v297_v35 = vpop.permute.xlu1 %296 }
 0x312   :  { %v307_v4 = vmul.f32 %v302_v30, %v297_v35  ;;  %v308_v3 = vmul.f32 %v306_v27, %v297_v35  ;;  %v405_v41 = vmul.f32 %v400_v31, %v297_v35  ;;  %v406_v40 = vmul.f32 %v404_v5, %v297_v35 }
 0x314   :  { %v309_v42 = vadd.f32 %v307_v4, %v293_v36  ;;  %v310_v43 = vadd.f32 %v308_v3, %v294_v37  ;;  %v407_v44 = vadd.f32 %v405_v41, %v395_v38  ;;  %v408_v45 = vadd.f32 %v406_v40, %v396_v39 }
 0x316   :  { %311 = vst [vmem:[#allocation5] sm:$0xf] %v309_v42  ;;  %312 = vst [vmem:[#allocation5 + $0x8] sm:$0xf] %v310_v43  ;;  %v411_v30 = vrot.slane %v407_v44, 4  ;;  %v412_v46 = vrot.slane %v408_v45, 4 }
 0x318   :  { %415 = vst [vmem:[#allocation5] sm:$0xf0] %v411_v30  ;;  %416 = vst [vmem:[#allocation5 + $0x8] sm:$0xf0] %v412_v46 }
 0x319   :  { %496 = shalt.err (!%p493_p12)
}
 0x31a   :  { %s497_s14 = scalar_lea.hbm %s741_s3, 256 }
 0x31b   :  { %p498_p13 = scmp.ne.s32.totalorder %s741_s3, %s497_s14  ;;  %p501_p0 = scmp.lt.u32.totalorder %s497_s14, %s741_s3 }
 0x31d   :  { %p503_p1 = pnand %p501_p0, %p498_p13 }
 0x31f   :  { %506 = shalt.err (!%p503_p1)
}
 0x320   :  { %426 = dma.vmem_to_hbm [thread:$0]  %s424_s10, 256, %s741_s3, [#allocation4]  }
 0x321   :  { %509 = dma.done.wait [#allocation4], 256  }
 0x322   :  { %510 = vsyncadd [#allocation4], 4294967040 }
 0x323   :  { %430 = vsyncpa [#allocation3], 1 }
 0x324   :  { %431 = vsyncpa [#allocation4], 1 }

</bundles_post_ra>
